<compile_context>
chip_gen: v7x
topology: tpu7x:2x2x1
jax: 0.10.0
libtpu: 0.0.40
codegen_flags: <defaults>
</compile_context>

<pallas_src>
import jax
import jax.numpy as jnp
from jax.experimental import pallas as pl
from jax.experimental.pallas import tpu as pltpu


def _patch_embed_kernel(p_ref, w_ref, pos_ref, o_ref):
    # p_ref:   (TB, Np, K)  bf16  im2col patches; row 0 of each batch slab is
    #                              zeros (the cls slot).
    # w_ref:   (K, E)       bf16  flattened Conv2d weight, transposed
    #                              (VMEM-resident via constant index_map).
    # pos_ref: (Np, E)      f32   row 0 = cls_token + positions[0];
    #                              rows 1..N = positions[1:] + conv_b.
    # o_ref:   (TB, Np, E)  f32   final output block (token-0 aligned).
    TB = p_ref.shape[0]
    w = w_ref[...]
    pos = pos_ref[...]
    # Static unroll over the (small) batch tile: TB back-to-back 2-D MXU
    # matmuls sharing the same RHS, each followed by one full-slab,
    # sublane/lane-aligned store.  Avoids the (TB,Np,K)->(TB*Np,K) reshape
    # that would force a VMEM relayout when Np is not a multiple of 8.
    for b in range(TB):
        acc = jnp.dot(p_ref[b], w, preferred_element_type=jnp.float32)
        o_ref[b] = (acc + pos).astype(o_ref.dtype)


def _pick_batch_tile(B, tokens, target_rows=1024):
    """Batch tile so each grid step feeds ~target_rows rows to the MXU, while
    keeping >= 2 grid steps when B >= 2 (both v7x TensorCores get work) and a
    bounded unroll factor. Ragged B is handled by padding (cdiv grid)."""
    tb = max(1, target_rows // max(tokens, 1))
    tb = min(tb, 16)              # bound static unroll / VMEM block size
    if B >= 2:
        tb = min(tb, B // 2)      # grid length >= 2 for megacore sharding
    return max(1, min(tb, B))


def patch_embedding_forward(x, conv_w, conv_b, cls_token, positions, patch_size,
                            *, compute_dtype=jnp.bfloat16,
                            out_dtype=jnp.float32):
    """x: (B, C, H, W) float32. Returns (B, N+1, E) in out_dtype (default f32)."""
    B, C, H, W = x.shape
    P = patch_size
    hp, wp = H // P, W // P
    N = hp * wp
    E = conv_w.shape[0]
    K = C * P * P
    Np = N + 1  # tokens including cls

    # --- im2col glue (HBM side) ---------------------------------------------
    # TODO(synk): fuse the im2col into the kernel (grid over (batch, patch-row)
    # with an x-block of (TB, C, P, W) and an in-VMEM reshuffle) to drop this
    # extra HBM round trip of x on mem-bound v5e/v6e.
    patches = x.reshape(B, C, hp, P, wp, P).transpose(0, 2, 4, 1, 3, 5)
    patches = patches.reshape(B, N, K).astype(compute_dtype)          # bf16 stream
    # Prepend a zero row per batch (the cls slot) so the kernel output is a
    # single full-block, token-0-aligned store.
    patches = jnp.concatenate(
        [jnp.zeros((B, 1, K), compute_dtype), patches], axis=1)       # (B, Np, K)

    w_flat_t = conv_w.reshape(E, K).T.astype(compute_dtype)           # (K, E) bf16
    # Fold conv bias into positions[1:] and cls_token+positions[0] into row 0.
    # Kept f32 so the bias/pos add happens in f32 after f32 MXU accumulation.
    pos_full = jnp.concatenate(
        [cls_token.reshape(1, E) + positions[0:1],
         positions[1:] + conv_b[None, :]], axis=0).astype(jnp.float32)  # (Np, E)

    TB = _pick_batch_tile(B, Np)
    grid_b = pl.cdiv(B, TB)
    B_pad = grid_b * TB
    if B_pad != B:  # ragged batch: pad with zero batches, slice after the call
        patches = jnp.pad(patches, ((0, B_pad - B), (0, 0), (0, 0)))

    out = pl.pallas_call(
        _patch_embed_kernel,
        out_shape=jax.ShapeDtypeStruct((B_pad, Np, E), out_dtype),
        grid_spec=pltpu.PrefetchScalarGridSpec(
            num_scalar_prefetch=0,
            grid=(grid_b,),
            in_specs=[
                # Blocks keep (Np, K)/(Np, E) equal to the full trailing dims,
                # so the (8,128) rule holds for any N / toy sizes.
                pl.BlockSpec((TB, Np, K), lambda i: (i, 0, 0)),
                pl.BlockSpec((K, E), lambda i: (0, 0)),    # VMEM-resident
                pl.BlockSpec((Np, E), lambda i: (0, 0)),   # VMEM-resident
            ],
            out_specs=pl.BlockSpec((TB, Np, E), lambda i: (i, 0, 0)),
        ),
        compiler_params=pltpu.CompilerParams(
            dimension_semantics=("parallel",),
            # ~1k-row tiles double-buffered stay ~13 MiB at ViT-Base sizes:
            # raise the scoped limit explicitly (v5e default is only 16 MiB)
            # while staying well inside v7x's 64 MiB physical VMEM.
            vmem_limit_bytes=32 * 1024 * 1024),
    )(patches, w_flat_t, pos_full)

    return out[:B] if B_pad != B else out


if __name__ == "__main__":
    # Small shapes consistent with the module: in_channels=4, patch_size=4,
    # emb_size=32, img_size=16 -> 4x4=16 patches, seq len 17.
    B, C, H, W = 2, 4, 16, 16
    P, E = 4, 32
    N = (H // P) * (W // P)

    key = jax.random.PRNGKey(0)
    kx, kw, kb, kc, kp = jax.random.split(key, 5)
    x = jax.random.normal(kx, (B, C, H, W), dtype=jnp.float32)
    conv_w = jax.random.normal(kw, (E, C, P, P), dtype=jnp.float32) * 0.02
    conv_b = jax.random.normal(kb, (E,), dtype=jnp.float32) * 0.02
    cls_token = jax.random.normal(kc, (1, 1, E), dtype=jnp.float32)
    positions = jax.random.normal(kp, (N + 1, E), dtype=jnp.float32)

    out = patch_embedding_forward(x, conv_w, conv_b, cls_token, positions, P)
    out = jax.block_until_ready(out)

    # Reference check in plain f32 JAX (same math as the PyTorch module).
    patches = x.reshape(B, C, H // P, P, W // P, P)
    patches = patches.transpose(0, 2, 4, 1, 3, 5).reshape(B, N, C * P * P)
    ref_patch = patches @ conv_w.reshape(E, -1).T + conv_b[None, None, :]
    ref = jnp.concatenate(
        [jnp.broadcast_to(cls_token, (B, 1, E)), ref_patch], axis=1) + positions[None]

    assert out.shape == (B, N + 1, E)
    # bf16 streamed operands (f32 accumulation) -> looser tolerance than pure f32.
    err = float(jnp.max(jnp.abs(out - ref)))
    assert jnp.allclose(out, ref, atol=2e-2, rtol=2e-2), f"max abs err = {err}"

    print("KERNEL_OK")
</pallas_src>

<mosaic_0001>
module attributes {stable_mosaic.version = 11 : i64} {
  func.func @_patch_embed_kernel(%arg0: i32, %arg1: memref<1x17x64xbf16, #tpu.memory_space<vmem>>, %arg2: memref<64x32xbf16, #tpu.memory_space<vmem>>, %arg3: memref<17x32xf32, #tpu.memory_space<vmem>>, %arg4: memref<1x17x32xf32, #tpu.memory_space<vmem>>) attributes {dimension_semantics = [#tpu.dimension_semantics<parallel>], iteration_bounds = array<i64: 2>, scalar_prefetch = 0 : i64, scratch_operands = 0 : i64, tpu.core_type = #tpu.core_type<tc>, window_params = [{transform_indices = @transform_0, window_bounds = array<i64: 1, 17, 64>}, {pipeline_mode = #tpu.pipeline_mode<synchronous>, transform_indices = @transform_1, window_bounds = array<i64: 64, 32>}, {pipeline_mode = #tpu.pipeline_mode<synchronous>, transform_indices = @transform_2, window_bounds = array<i64: 17, 32>}, {transform_indices = @transform_3, window_bounds = array<i64: 1, 17, 32>}]} {
    %c0 = arith.constant 0 : index
    %c0_0 = arith.constant 0 : index
    %0 = vector.load %arg2[%c0, %c0_0] : memref<64x32xbf16, #tpu.memory_space<vmem>>, vector<64x32xbf16>
    %c0_1 = arith.constant 0 : index
    %c0_2 = arith.constant 0 : index
    %1 = vector.load %arg3[%c0_1, %c0_2] : memref<17x32xf32, #tpu.memory_space<vmem>>, vector<17x32xf32>
    %c0_3 = arith.constant 0 : index
    %c0_4 = arith.constant 0 : index
    %c0_5 = arith.constant 0 : index
    %2 = vector.load %arg1[%c0_3, %c0_4, %c0_5] : memref<1x17x64xbf16, #tpu.memory_space<vmem>>, vector<1x17x64xbf16>
    %3 = vector.shape_cast %2 : vector<1x17x64xbf16> to vector<17x64xbf16>
    %cst = arith.constant dense<0.000000e+00> : vector<17x32xf32>
    %4 = tpu.matmul %3, %0, %cst {dimension_numbers = #tpu.dot_dimension_numbers<[1], [0], [0], [1], [0, 0, 1, 1], [], []>} : vector<17x64xbf16>, vector<64x32xbf16>, vector<17x32xf32> -> vector<17x32xf32>
    %5 = arith.addf %4, %1 : vector<17x32xf32>
    %c0_6 = arith.constant 0 : index
    %c0_7 = arith.constant 0 : index
    %c0_8 = arith.constant 0 : index
    %6 = vector.load %arg4[%c0_6, %c0_7, %c0_8] : memref<1x17x32xf32, #tpu.memory_space<vmem>>, vector<1x17x32xf32>
    %7 = vector.shape_cast %6 : vector<1x17x32xf32> to vector<17x32xf32>
    %8 = vector.shape_cast %5 : vector<17x32xf32> to vector<1x17x32xf32>
    tpu.vector_store %arg4[%c0_6, %c0_7, %c0_8], %8 {strides = array<i32>} : memref<1x17x32xf32, #tpu.memory_space<vmem>>, vector<1x17x32xf32>,
    return
  }
  func.func @transform_0(%arg0: i32) -> (i32, i32, i32) {
    %c0_i32 = arith.constant 0 : i32
    %c0_i32_0 = arith.constant 0 : i32
    %c0_i32_1 = arith.constant 0 : i32
    return %arg0, %c0_i32, %c0_i32_0 : i32, i32, i32
  }
  func.func @transform_1(%arg0: i32) -> (i32, i32) {
    %c0_i32 = arith.constant 0 : i32
    %c0_i32_0 = arith.constant 0 : i32
    %c0_i32_1 = arith.constant 0 : i32
    return %c0_i32, %c0_i32_0 : i32, i32
  }
  func.func @transform_2(%arg0: i32) -> (i32, i32) {
    %c0_i32 = arith.constant 0 : i32
    %c0_i32_0 = arith.constant 0 : i32
    %c0_i32_1 = arith.constant 0 : i32
    return %c0_i32, %c0_i32_0 : i32, i32
  }
  func.func @transform_3(%arg0: i32) -> (i32, i32, i32) {
    %c0_i32 = arith.constant 0 : i32
    %c0_i32_0 = arith.constant 0 : i32
    %c0_i32_1 = arith.constant 0 : i32
    return %arg0, %c0_i32, %c0_i32_0 : i32, i32, i32
  }
}

</mosaic_0001>

<bundles_post_ra>
// kernel: tpu_custom_call.1
= control target key start
LH: loop header
LB: loop body
LE: loop exit
PB: predicated region body
PF: predicated region fallthrough
CT: control target
= control target key end

     0   :  { %s412_s12 = smov 0   ;;  %s450_s0 = inlined_call_operand.vmem [shape: bf16[2,17,64], index: 0, kind: input, shape index: {}]   ;;  %s451_s1 = inlined_call_operand.vmem [shape: bf16[64,32], index: 1, kind: input, shape index: {}]   ;;  %s452_s2 = inlined_call_operand.vmem [shape: f32[17,32], index: 2, kind: input, shape index: {}]   ;;  %s453_s3 = inlined_call_operand.vmem [shape: f32[2,17,32], index: 3, kind: output, shape index: {}]  }
   0x1 LB: > { %s333_s13 = sadd.s32 4294967295, %s390_s12   ;;  %p337_p0 = scmp.ge.s32.totalorder %s390_s12, 1  ;;  %s390_s12 = sphi %s412_s12, %s13_s12  }
   0x2   : > { %p137_p1 = scmp.lt.s32.totalorder %s390_s12, 3 }
   0x4   : > { %p138_p2 = pnand %p337_p0, %p137_p1 }
   0x5   : > { %v378_v0 = vld [vmem:[%s451_s1] sm:$0xff] (!%p138_p2)   ;;  %p161_p3 = scmp.lt.s32.totalorder (!%p138_p2), %s333_s13, 1  ;;  %v379_v1 = vld [vmem:[%s451_s1 + $0x8] sm:$0xff] (!%p138_p2)   ;;  %v380_v2 = vld [vmem:[%s451_s1 + $0x10] sm:$0xff] (!%p138_p2)   ;;  %vm218_vm0 = vcmask (!%p138_p2), 523264   ;;  %vm276_vm1 = vcmask (!%p138_p2), 253952  }
   0x6   : > { %141 = sbr.rel (%p138_p2) target bundleno = 240 (0xf0), region = 32  ;;  %356 = vmatprep.subr.bf16.mxu0 (!%p138_p2), %v378_v0  ;;  %v381_v3 = vld [vmem:[%s451_s1 + $0x18] sm:$0xff] (!%p138_p2)   ;;  %v182_v6 = vld [vmem:[%s452_s2 + $0x10] sm:$0x1] (!%p138_p2)  ;;  %v180_v7 = vld [vmem:[%s452_s2] sm:$0xff] (!%p138_p2)  ;;  %vm273_vm2 = vcmask (!%p138_p2), 261120  }
   0x7   : > { %357 = vmatpush3.bf16.msra.mxu0 (!%p138_p2), %v378_v0  ;;  %v181_v11 = vld [vmem:[%s452_s2 + $0x8] sm:$0xff] (!%p138_p2) }
   0x8   : > { %358 = vmatprep.subr.bf16.mxu0 (!%p138_p2), %v379_v1 }
   0xb   : > { %359 = vmatpush3.bf16.msra.mxu0 (!%p138_p2), %v379_v1 }
   0xc   : > { %360 = vmatprep.subr.bf16.mxu0 (!%p138_p2), %v380_v2 }
   0xd   : > { %s455_s13 = smov (!%p161_p3, %s333_s13), 1 }
   0xe   : > { %s368_s20 = smul.u32 12, %s455_s13 }
   0xf   : > { %361 = vmatpush3.bf16.msra.mxu0 %v380_v2  ;;  %s369_s26 = smul.u32 24, %s455_s13 }
  0x10   : > { %s165_s23 = scalar_lea.vmem %s450_s0, %s368_s20  ;;  %362 = vmatprep.subr.bf16.mxu0 %v381_v3 }
  0x11   : > { %v382_v4 = vld [vmem:[%s165_s23] sm:$0xff]   ;;  %v383_v5 = vld [vmem:[%s165_s23 + $0x8] ss:$0 sps:$4 sm:$0x11]   ;;  %s170_s6 = scalar_lea.vmem %s453_s3, %s369_s26 }
  0x12   : > { %364 = vmatprep.mubr.msk.bf16.mxu0 %vm218_vm0, %v382_v4 }
  0x13   : > { %363 = vmatpush3.bf16.msra.mxu0 %v381_v3 }
  0x16   : > { %365 = vmatmul.mubr.msk.bf16.vlgmr.msra.gmra.mrb[0].mxu0 %vm218_vm0, %v383_v5 }
  0xe9   : > { %v366_v8 = vpop.f32.mrb[0].mxu0 }
  0xea   : > { %v268_v9 = vadd.f32 %v366_v8, %v182_v6  ;;  %v259_v10 = vpop.f32.mrb[1].mxu0 }
  0xeb   : > { %v260_v12 = vadd.f32 %v259_v10, %v180_v7  ;;  %v367_v13 = vpop.f32.mrb[2].mxu0 }
  0xec   : > { %277 = vst.msk [vmem:[%s170_s6 + $0x10] sm:$0x1] %vm276_vm1, %v268_v9  ;;  %v262_v14 = vpop.f32.mrb[3].mxu0 }
  0xed   : > { %274 = vst.msk [vmem:[%s170_s6] sm:$0xff] %vm273_vm2, %v260_v12  ;;  %v263_v15 = vadd.f32 %v262_v14, %v181_v11 }
  0xef   : > { %275 = vst.msk [vmem:[%s170_s6 + $0x8] sm:$0xff] %vm273_vm2, %v263_v15 }
  0xf0 PF: > { %s13_s12 = sadd.s32 1, %s390_s12  }
  0xf1   : > { %p10_p4 = scmp.ge.s32.totalorder %s13_s12, 4  }
  0xf3   :  { %12 = sbr.rel (!%p10_p4) target bundleno = 1 (0x1), region = 62 }

</bundles_post_ra>
